<compile_context>
chip_gen: v6e
topology: v6e:2x2x1
jax: 0.10.0
libtpu: 0.0.40
codegen_flags: <defaults>
</compile_context>

<pallas_src>
import functools

import jax
import jax.numpy as jnp
from jax import lax
from jax.experimental import pallas as pl
from jax.experimental.pallas import tpu as pltpu

_LANE = 128                 # vreg lane width (v5e/v6e/v7x)
_SUBLANE = 8                # f32 sublane count
_MAX_TM = 1024              # cap on batch-tile rows
_UNROLL_MAX_LAYERS = 6      # statically unroll the layer loop up to this depth
_VMEM_BUDGET = 48 << 20     # conservative working budget (fits v7x scoped VMEM)
_VMEM_FLOOR = 32 << 20      # never declare less than the v6e/v7x scoped default
_VMEM_CEILING = 64 << 20    # never declare more than v7x physical VMEM


def _round_up(n, m):
    return ((n + m - 1) // m) * m


# --------------------------------------------------------------------------- #
# Kernel
# --------------------------------------------------------------------------- #
def _fused_mlp_kernel(x_ref, w_ref, b_ref, o_ref, *, num_layers, f_pad, f_out_pad):
    """x_ref: (tm, f_in_pad) f32; w_ref: (L, f_pad, f_pad) bf16;
    b_ref: (L, 1, f_pad) bf16; o_ref: (tm, f_out_pad) f32."""
    tm, f_in_pad = x_ref.shape
    h = x_ref[...].astype(jnp.float32)
    if f_in_pad < f_pad:
        # Widen to the common hidden width with zero lanes (cheap, stays on-chip).
        h = jnp.concatenate(
            [h, jnp.zeros((tm, f_pad - f_in_pad), jnp.float32)], axis=1)

    def layer(l, h):
        # bf16 x bf16 on the MXU, f32 accumulation.
        y = jnp.dot(h.astype(jnp.bfloat16), w_ref[l],
                    preferred_element_type=jnp.float32)
        y = y + b_ref[l].astype(jnp.float32)          # (tm,f_pad) + (1,f_pad)
        return jnp.maximum(y, 0.0)                    # ReLU on the VPU

    if num_layers <= _UNROLL_MAX_LAYERS:
        for l in range(num_layers):                   # tiny L: unroll statically
            h = layer(l, h)
    else:
        # Deep MLP: keep one layer live (bounds vreg/VMEM pressure + compile time).
        h = lax.fori_loop(0, num_layers, layer, h)

    # Store only the lanes the real output needs (still lane-dense: 128-multiple).
    o_ref[...] = h[:, :f_out_pad].astype(o_ref.dtype)


# --------------------------------------------------------------------------- #
# Parameter construction / packing
# --------------------------------------------------------------------------- #
def init_ann_params(layers, key):
    """Per-layer (w, b) matching nn.Linear defaults, stored transposed:
    w (f_in, f_out), b (f_out,)."""
    params = []
    for i in range(len(layers) - 1):
        f_in, f_out = layers[i], layers[i + 1]
        key, kw, kb = jax.random.split(key, 3)
        bound = 1.0 / jnp.sqrt(jnp.float32(f_in))     # PyTorch default init bound
        w = jax.random.uniform(kw, (f_in, f_out), jnp.float32, -bound, bound)
        b = jax.random.uniform(kb, (f_out,), jnp.float32, -bound, bound)
        params.append((w, b))
    return params


def pack_ann_params(params):
    """Zero-pad every layer to a common 128-multiple width, stack into two
    buffers, and store them in bf16 (MXU-native)."""
    num_layers = len(params)
    f_dims = [params[0][0].shape[0]] + [w.shape[1] for w, _ in params]
    f_pad = max(_round_up(d, _LANE) for d in f_dims)
    w_stack = jnp.zeros((num_layers, f_pad, f_pad), jnp.float32)
    b_stack = jnp.zeros((num_layers, 1, f_pad), jnp.float32)
    for l, (w, b) in enumerate(params):
        f_i, f_o = w.shape
        w_stack = w_stack.at[l, :f_i, :f_o].set(w.astype(jnp.float32))
        b_stack = b_stack.at[l, 0, :f_o].set(b.astype(jnp.float32))
    # bf16 weights: 2x MXU throughput vs f32, half the resident VMEM / DMA bytes.
    # TODO(synk): on v7x an fp8 weight format would quarter the footprint further.
    w_stack = w_stack.astype(jnp.bfloat16)
    b_stack = b_stack.astype(jnp.bfloat16)
    meta = {
        "f_in": f_dims[0],
        "f_out": f_dims[-1],
        "f_pad": f_pad,
        "f_in_pad": _round_up(f_dims[0], _LANE),
        "f_out_pad": _round_up(f_dims[-1], _LANE),
        "num_layers": num_layers,
    }
    return w_stack, b_stack, meta


# --------------------------------------------------------------------------- #
# Forward wrapper
# --------------------------------------------------------------------------- #
def _choose_batch_tiling(B, f_in_pad, f_pad, f_out_pad, resident_bytes):
    """Pick (tm, num_tiles, per_row_bytes) from the VMEM budget."""
    # Bytes that scale with tm: double-buffered f32 in/out tiles plus a few live
    # (tm, f_pad) f32 intermediates inside the layer loop.
    per_row = 4 * (2 * f_in_pad + 2 * f_out_pad + 4 * f_pad)
    budget = max(_VMEM_BUDGET - resident_bytes, 4 << 20)
    tm_cap = (budget // per_row) // _SUBLANE * _SUBLANE
    tm_cap = max(_SUBLANE, min(_MAX_TM, tm_cap))
    num_tiles = pl.cdiv(B, tm_cap)
    # v7x has 2 TensorCores: give a big batch at least 2 "parallel" grid tiles.
    if num_tiles == 1 and B >= 256:
        num_tiles = 2
    tm = _round_up(pl.cdiv(B, num_tiles), _SUBLANE)   # <= 8*num_tiles-1 padded rows
    return tm, num_tiles, per_row


def ann_forward(x, w_stack, b_stack, meta):
    """x: (B, f_in) float32 -> (B, f_out) float32. Single fused pallas_call."""
    B = x.shape[0]
    f_in, f_out = meta["f_in"], meta["f_out"]
    f_pad, f_in_pad, f_out_pad = meta["f_pad"], meta["f_in_pad"], meta["f_out_pad"]
    num_layers = meta["num_layers"]

    resident = (w_stack.size * w_stack.dtype.itemsize
                + b_stack.size * b_stack.dtype.itemsize)
    tm, num_tiles, per_row = _choose_batch_tiling(
        B, f_in_pad, f_pad, f_out_pad, resident)
    b_pad = tm * num_tiles

    # Pad only what is needed (feature dim to its own 128-multiple, batch to the
    # tile grid). No full-size (b_pad, f_pad) zero scatter in HBM.
    x = x.astype(jnp.float32)
    if b_pad != B or f_in_pad != f_in:
        x = jnp.pad(x, ((0, b_pad - B), (0, f_in_pad - f_in)))

    vmem_limit = int(min(_VMEM_CEILING,
                         max(_VMEM_FLOOR, resident + per_row * tm + (8 << 20))))

    kernel = functools.partial(
        _fused_mlp_kernel, num_layers=num_layers, f_pad=f_pad, f_out_pad=f_out_pad)

    def build(single_buffer_weights):
        # Weights/biases never change across the batch grid -> 1 pipeline buffer.
        wkw = {"pipeline_mode": pl.Buffered(1)} if single_buffer_weights else {}
        return pl.pallas_call(
            kernel,
            out_shape=jax.ShapeDtypeStruct((b_pad, f_out_pad), jnp.float32),
            grid_spec=pltpu.PrefetchScalarGridSpec(
                num_scalar_prefetch=0,
                grid=(num_tiles,),
                in_specs=[
                    # activations: tiled over batch, narrow (f_in_pad) stream
                    pl.BlockSpec((tm, f_in_pad), lambda i: (i, 0)),
                    # weights / biases: VMEM-resident across all tiles
                    pl.BlockSpec((num_layers, f_pad, f_pad),
                                 lambda i: (0, 0, 0), **wkw),
                    pl.BlockSpec((num_layers, 1, f_pad),
                                 lambda i: (0, 0, 0), **wkw),
                ],
                out_specs=pl.BlockSpec((tm, f_out_pad), lambda i: (i, 0)),
            ),
            compiler_params=pltpu.CompilerParams(
                dimension_semantics=("parallel",),    # shard tiles across v7x's 2 TCs
                vmem_limit_bytes=vmem_limit,
            ),
        )

    try:
        out_pad = build(True)(x, w_stack, b_stack)
    except Exception:
        # Fallback for jax builds without BlockSpec pipeline_mode support.
        out_pad = build(False)(x, w_stack, b_stack)

    return out_pad[:B, :f_out]


# --------------------------------------------------------------------------- #
# Pure-JAX reference (matches the PyTorch module: ReLU after every Linear)
# --------------------------------------------------------------------------- #
def ann_reference(x, params, compute_dtype=jnp.float32):
    h = x.astype(jnp.float32)
    for w, b in params:
        y = jnp.dot(h.astype(compute_dtype), w.astype(compute_dtype),
                    preferred_element_type=jnp.float32)
        h = jnp.maximum(y + b.astype(compute_dtype).astype(jnp.float32), 0.0)
    return h


if __name__ == "__main__":
    key = jax.random.PRNGKey(0)
    layers = [32, 64, 64, 16]   # 3 Linear+ReLU blocks
    batch = 8

    key, kx = jax.random.split(key)
    x = jax.random.normal(kx, (batch, layers[0]), jnp.float32)
    params = init_ann_params(layers, key)
    w_stack, b_stack, meta = pack_ann_params(params)   # one-time pad + pack (bf16)

    out = jax.block_until_ready(ann_forward(x, w_stack, b_stack, meta))
    assert out.shape == (batch, layers[-1])

    # Tight check vs a reference that mirrors the kernel numerics
    # (bf16 operands, f32 accumulation).
    ref_bf16 = ann_reference(x, params, jnp.bfloat16)
    assert jnp.allclose(out, ref_bf16, atol=1e-2, rtol=1e-2)

    # Loose sanity check vs the full-f32 PyTorch-equivalent reference
    # (bf16 weights => expected small precision loss, not a bug).
    ref_f32 = ann_reference(x, params, jnp.float32)
    assert jnp.allclose(out, ref_f32, atol=1e-1, rtol=1e-1)

    print("KERNEL_OK")
</pallas_src>

<mosaic_0001>
module attributes {stable_mosaic.version = 11 : i64} {
  func.func @_fused_mlp_kernel(%arg0: i32, %arg1: memref<8x128xf32, #tpu.memory_space<vmem>>, %arg2: memref<3x128x128xbf16, #tpu.memory_space<vmem>>, %arg3: memref<3x1x128xbf16, #tpu.memory_space<vmem>>, %arg4: memref<8x128xf32, #tpu.memory_space<vmem>>) attributes {dimension_semantics = [#tpu.dimension_semantics<parallel>], iteration_bounds = array<i64: 1>, scalar_prefetch = 0 : i64, scratch_operands = 0 : i64, tpu.core_type = #tpu.core_type<tc>, window_params = [{transform_indices = @transform_0, window_bounds = array<i64: 8, 128>}, {pipeline_mode = #tpu.pipeline_mode<synchronous>, transform_indices = @transform_1, window_bounds = array<i64: 3, 128, 128>}, {pipeline_mode = #tpu.pipeline_mode<synchronous>, transform_indices = @transform_2, window_bounds = array<i64: 3, 1, 128>}, {transform_indices = @transform_3, window_bounds = array<i64: 8, 128>}]} {
    %c0 = arith.constant 0 : index
    %c0_0 = arith.constant 0 : index
    %0 = vector.load %arg1[%c0, %c0_0] : memref<8x128xf32, #tpu.memory_space<vmem>>, vector<8x128xf32>
    %1 = arith.truncf %0 : vector<8x128xf32> to vector<8x128xbf16>
    %c0_1 = arith.constant 0 : index
    %c0_2 = arith.constant 0 : index
    %c0_3 = arith.constant 0 : index
    %2 = vector.load %arg2[%c0_1, %c0_2, %c0_3] : memref<3x128x128xbf16, #tpu.memory_space<vmem>>, vector<1x128x128xbf16>
    %3 = vector.shape_cast %2 : vector<1x128x128xbf16> to vector<128x128xbf16>
    %cst = arith.constant dense<0.000000e+00> : vector<8x128xf32>
    %4 = tpu.matmul %1, %3, %cst {dimension_numbers = #tpu.dot_dimension_numbers<[1], [0], [0], [1], [0, 0, 1, 1], [], []>} : vector<8x128xbf16>, vector<128x128xbf16>, vector<8x128xf32> -> vector<8x128xf32>
    %c0_4 = arith.constant 0 : index
    %c0_5 = arith.constant 0 : index
    %c0_6 = arith.constant 0 : index
    %5 = vector.load %arg3[%c0_4, %c0_5, %c0_6] : memref<3x1x128xbf16, #tpu.memory_space<vmem>>, vector<1x1x128xbf16>
    %6 = vector.shape_cast %5 : vector<1x1x128xbf16> to vector<1x128xbf16>
    %7 = arith.extf %6 : vector<1x128xbf16> to vector<1x128xf32>
    %8 = vector.broadcast %7 : vector<1x128xf32> to vector<8x128xf32>
    %9 = arith.addf %4, %8 : vector<8x128xf32>
    %cst_7 = arith.constant 0.000000e+00 : f32
    %10 = vector.broadcast %cst_7 : f32 to vector<8x128xf32>
    %11 = arith.maximumf %9, %10 : vector<8x128xf32>
    %12 = arith.truncf %11 : vector<8x128xf32> to vector<8x128xbf16>
    %c1 = arith.constant 1 : index
    %c0_8 = arith.constant 0 : index
    %c0_9 = arith.constant 0 : index
    %13 = vector.load %arg2[%c1, %c0_8, %c0_9] : memref<3x128x128xbf16, #tpu.memory_space<vmem>>, vector<1x128x128xbf16>
    %14 = vector.shape_cast %13 : vector<1x128x128xbf16> to vector<128x128xbf16>
    %cst_10 = arith.constant dense<0.000000e+00> : vector<8x128xf32>
    %15 = tpu.matmul %12, %14, %cst_10 {dimension_numbers = #tpu.dot_dimension_numbers<[1], [0], [0], [1], [0, 0, 1, 1], [], []>} : vector<8x128xbf16>, vector<128x128xbf16>, vector<8x128xf32> -> vector<8x128xf32>
    %c1_11 = arith.constant 1 : index
    %c0_12 = arith.constant 0 : index
    %c0_13 = arith.constant 0 : index
    %16 = vector.load %arg3[%c1_11, %c0_12, %c0_13] : memref<3x1x128xbf16, #tpu.memory_space<vmem>>, vector<1x1x128xbf16>
    %17 = vector.shape_cast %16 : vector<1x1x128xbf16> to vector<1x128xbf16>
    %18 = arith.extf %17 : vector<1x128xbf16> to vector<1x128xf32>
    %19 = vector.broadcast %18 : vector<1x128xf32> to vector<8x128xf32>
    %20 = arith.addf %15, %19 : vector<8x128xf32>
    %cst_14 = arith.constant 0.000000e+00 : f32
    %21 = vector.broadcast %cst_14 : f32 to vector<8x128xf32>
    %22 = arith.maximumf %20, %21 : vector<8x128xf32>
    %23 = arith.truncf %22 : vector<8x128xf32> to vector<8x128xbf16>
    %c2 = arith.constant 2 : index
    %c0_15 = arith.constant 0 : index
    %c0_16 = arith.constant 0 : index
    %24 = vector.load %arg2[%c2, %c0_15, %c0_16] : memref<3x128x128xbf16, #tpu.memory_space<vmem>>, vector<1x128x128xbf16>
    %25 = vector.shape_cast %24 : vector<1x128x128xbf16> to vector<128x128xbf16>
    %cst_17 = arith.constant dense<0.000000e+00> : vector<8x128xf32>
    %26 = tpu.matmul %23, %25, %cst_17 {dimension_numbers = #tpu.dot_dimension_numbers<[1], [0], [0], [1], [0, 0, 1, 1], [], []>} : vector<8x128xbf16>, vector<128x128xbf16>, vector<8x128xf32> -> vector<8x128xf32>
    %c2_18 = arith.constant 2 : index
    %c0_19 = arith.constant 0 : index
    %c0_20 = arith.constant 0 : index
    %27 = vector.load %arg3[%c2_18, %c0_19, %c0_20] : memref<3x1x128xbf16, #tpu.memory_space<vmem>>, vector<1x1x128xbf16>
    %28 = vector.shape_cast %27 : vector<1x1x128xbf16> to vector<1x128xbf16>
    %29 = arith.extf %28 : vector<1x128xbf16> to vector<1x128xf32>
    %30 = vector.broadcast %29 : vector<1x128xf32> to vector<8x128xf32>
    %31 = arith.addf %26, %30 : vector<8x128xf32>
    %cst_21 = arith.constant 0.000000e+00 : f32
    %32 = vector.broadcast %cst_21 : f32 to vector<8x128xf32>
    %33 = arith.maximumf %31, %32 : vector<8x128xf32>
    %c0_22 = arith.constant 0 : index
    %c0_23 = arith.constant 0 : index
    %34 = vector.load %arg4[%c0_22, %c0_23] : memref<8x128xf32, #tpu.memory_space<vmem>>, vector<8x128xf32>
    tpu.vector_store %arg4[%c0_22, %c0_23], %33 {strides = array<i32>} : memref<8x128xf32, #tpu.memory_space<vmem>>, vector<8x128xf32>,
    return
  }
  func.func @transform_0(%arg0: i32) -> (i32, i32) {
    %c0_i32 = arith.constant 0 : i32
    %c0_i32_0 = arith.constant 0 : i32
    return %arg0, %c0_i32 : i32, i32
  }
  func.func @transform_1(%arg0: i32) -> (i32, i32, i32) {
    %c0_i32 = arith.constant 0 : i32
    %c0_i32_0 = arith.constant 0 : i32
    %c0_i32_1 = arith.constant 0 : i32
    %c0_i32_2 = arith.constant 0 : i32
    return %c0_i32, %c0_i32_0, %c0_i32_1 : i32, i32, i32
  }
  func.func @transform_2(%arg0: i32) -> (i32, i32, i32) {
    %c0_i32 = arith.constant 0 : i32
    %c0_i32_0 = arith.constant 0 : i32
    %c0_i32_1 = arith.constant 0 : i32
    %c0_i32_2 = arith.constant 0 : i32
    return %c0_i32, %c0_i32_0, %c0_i32_1 : i32, i32, i32
  }
  func.func @transform_3(%arg0: i32) -> (i32, i32) {
    %c0_i32 = arith.constant 0 : i32
    %c0_i32_0 = arith.constant 0 : i32
    return %arg0, %c0_i32 : i32, i32
  }
}

module attributes {stable_mosaic.version = 11 : i64} {
  func.func @_fused_mlp_kernel(%arg0: i32, %arg1: memref<8x128xf32, #tpu.memory_space<vmem>>, %arg2: memref<3x128x128xbf16, #tpu.memory_space<vmem>>, %arg3: memref<3x1x128xbf16, #tpu.memory_space<vmem>>, %arg4: memref<8x128xf32, #tpu.memory_space<vmem>>) attributes {dimension_semantics = [#tpu.dimension_semantics<parallel>], iteration_bounds = array<i64: 1>, scalar_prefetch = 0 : i64, scratch_operands = 0 : i64, tpu.core_type = #tpu.core_type<tc>, window_params = [{transform_indices = @transform_0, window_bounds = array<i64: 8, 128>}, {pipeline_mode = #tpu.pipeline_mode<synchronous>, transform_indices = @transform_1, window_bounds = array<i64: 3, 128, 128>}, {pipeline_mode = #tpu.pipeline_mode<synchronous>, transform_indices = @transform_2, window_bounds = array<i64: 3, 1, 128>}, {transform_indices = @transform_3, window_bounds = array<i64: 8, 128>}]} {
    %c0 = arith.constant 0 : index
    %c0_0 = arith.constant 0 : index
    %0 = vector.load %arg1[%c0, %c0_0] : memref<8x128xf32, #tpu.memory_space<vmem>>, vector<8x128xf32>
    %1 = arith.truncf %0 : vector<8x128xf32> to vector<8x128xbf16>
    %c0_1 = arith.constant 0 : index
    %c0_2 = arith.constant 0 : index
    %c0_3 = arith.constant 0 : index
    %2 = vector.load %arg2[%c0_1, %c0_2, %c0_3] : memref<3x128x128xbf16, #tpu.memory_space<vmem>>, vector<1x128x128xbf16>
    %3 = vector.shape_cast %2 : vector<1x128x128xbf16> to vector<128x128xbf16>
    %cst = arith.constant dense<0.000000e+00> : vector<8x128xf32>
    %4 = tpu.matmul %1, %3, %cst {dimension_numbers = #tpu.dot_dimension_numbers<[1], [0], [0], [1], [0, 0, 1, 1], [], []>} : vector<8x128xbf16>, vector<128x128xbf16>, vector<8x128xf32> -> vector<8x128xf32>
    %c0_4 = arith.constant 0 : index
    %c0_5 = arith.constant 0 : index
    %c0_6 = arith.constant 0 : index
    %5 = vector.load %arg3[%c0_4, %c0_5, %c0_6] : memref<3x1x128xbf16, #tpu.memory_space<vmem>>, vector<1x1x128xbf16>
    %6 = vector.shape_cast %5 : vector<1x1x128xbf16> to vector<1x128xbf16>
    %7 = arith.extf %6 : vector<1x128xbf16> to vector<1x128xf32>
    %8 = vector.broadcast %7 : vector<1x128xf32> to vector<8x128xf32>
    %9 = arith.addf %4, %8 : vector<8x128xf32>
    %cst_7 = arith.constant 0.000000e+00 : f32
    %10 = vector.broadcast %cst_7 : f32 to vector<8x128xf32>
    %11 = arith.maximumf %9, %10 : vector<8x128xf32>
    %12 = arith.truncf %11 : vector<8x128xf32> to vector<8x128xbf16>
    %c1 = arith.constant 1 : index
    %c0_8 = arith.constant 0 : index
    %c0_9 = arith.constant 0 : index
    %13 = vector.load %arg2[%c1, %c0_8, %c0_9] : memref<3x128x128xbf16, #tpu.memory_space<vmem>>, vector<1x128x128xbf16>
    %14 = vector.shape_cast %13 : vector<1x128x128xbf16> to vector<128x128xbf16>
    %cst_10 = arith.constant dense<0.000000e+00> : vector<8x128xf32>
    %15 = tpu.matmul %12, %14, %cst_10 {dimension_numbers = #tpu.dot_dimension_numbers<[1], [0], [0], [1], [0, 0, 1, 1], [], []>} : vector<8x128xbf16>, vector<128x128xbf16>, vector<8x128xf32> -> vector<8x128xf32>
    %c1_11 = arith.constant 1 : index
    %c0_12 = arith.constant 0 : index
    %c0_13 = arith.constant 0 : index
    %16 = vector.load %arg3[%c1_11, %c0_12, %c0_13] : memref<3x1x128xbf16, #tpu.memory_space<vmem>>, vector<1x1x128xbf16>
    %17 = vector.shape_cast %16 : vector<1x1x128xbf16> to vector<1x128xbf16>
    %18 = arith.extf %17 : vector<1x128xbf16> to vector<1x128xf32>
    %19 = vector.broadcast %18 : vector<1x128xf32> to vector<8x128xf32>
    %20 = arith.addf %15, %19 : vector<8x128xf32>
    %cst_14 = arith.constant 0.000000e+00 : f32
    %21 = vector.broadcast %cst_14 : f32 to vector<8x128xf32>
    %22 = arith.maximumf %20, %21 : vector<8x128xf32>
    %23 = arith.truncf %22 : vector<8x128xf32> to vector<8x128xbf16>
    %c2 = arith.constant 2 : index
    %c0_15 = arith.constant 0 : index
    %c0_16 = arith.constant 0 : index
    %24 = vector.load %arg2[%c2, %c0_15, %c0_16] : memref<3x128x128xbf16, #tpu.memory_space<vmem>>, vector<1x128x128xbf16>
    %25 = vector.shape_cast %24 : vector<1x128x128xbf16> to vector<128x128xbf16>
    %cst_17 = arith.constant dense<0.000000e+00> : vector<8x128xf32>
    %26 = tpu.matmul %23, %25, %cst_17 {dimension_numbers = #tpu.dot_dimension_numbers<[1], [0], [0], [1], [0, 0, 1, 1], [], []>} : vector<8x128xbf16>, vector<128x128xbf16>, vector<8x128xf32> -> vector<8x128xf32>
    %c2_18 = arith.constant 2 : index
    %c0_19 = arith.constant 0 : index
    %c0_20 = arith.constant 0 : index
    %27 = vector.load %arg3[%c2_18, %c0_19, %c0_20] : memref<3x1x128xbf16, #tpu.memory_space<vmem>>, vector<1x1x128xbf16>
    %28 = vector.shape_cast %27 : vector<1x1x128xbf16> to vector<1x128xbf16>
    %29 = arith.extf %28 : vector<1x128xbf16> to vector<1x128xf32>
    %30 = vector.broadcast %29 : vector<1x128xf32> to vector<8x128xf32>
    %31 = arith.addf %26, %30 : vector<8x128xf32>
    %cst_21 = arith.constant 0.000000e+00 : f32
    %32 = vector.broadcast %cst_21 : f32 to vector<8x128xf32>
    %33 = arith.maximumf %31, %32 : vector<8x128xf32>
    %c0_22 = arith.constant 0 : index
    %c0_23 = arith.constant 0 : index
    %34 = vector.load %arg4[%c0_22, %c0_23] : memref<8x128xf32, #tpu.memory_space<vmem>>, vector<8x128xf32>
    tpu.vector_store %arg4[%c0_22, %c0_23], %33 {strides = array<i32>} : memref<8x128xf32, #tpu.memory_space<vmem>>, vector<8x128xf32>,
    return
  }
  func.func @transform_0(%arg0: i32) -> (i32, i32) {
    %c0_i32 = arith.constant 0 : i32
    %c0_i32_0 = arith.constant 0 : i32
    return %arg0, %c0_i32 : i32, i32
  }
  func.func @transform_1(%arg0: i32) -> (i32, i32, i32) {
    %c0_i32 = arith.constant 0 : i32
    %c0_i32_0 = arith.constant 0 : i32
    %c0_i32_1 = arith.constant 0 : i32
    %c0_i32_2 = arith.constant 0 : i32
    return %c0_i32, %c0_i32_0, %c0_i32_1 : i32, i32, i32
  }
  func.func @transform_2(%arg0: i32) -> (i32, i32, i32) {
    %c0_i32 = arith.constant 0 : i32
    %c0_i32_0 = arith.constant 0 : i32
    %c0_i32_1 = arith.constant 0 : i32
    %c0_i32_2 = arith.constant 0 : i32
    return %c0_i32, %c0_i32_0, %c0_i32_1 : i32, i32, i32
  }
  func.func @transform_3(%arg0: i32) -> (i32, i32) {
    %c0_i32 = arith.constant 0 : i32
    %c0_i32_0 = arith.constant 0 : i32
    return %arg0, %c0_i32 : i32, i32
  }
}

</mosaic_0001>

<bundles_post_ra>
// kernel: tpu_custom_call.1
= control target key start
LH: loop header
LB: loop body
LE: loop exit
PB: predicated region body
PF: predicated region fallthrough
CT: control target
= control target key end

     0   :  { %8 = vsyncpa [#allocation3], 0  ;;  %s685_s0 = inlined_call_operand.hbm [shape: f32[8,128], index: 0, kind: input, shape index: {}]   ;;  %s686_s1 = inlined_call_operand.hbm [shape: bf16[3,128,128], index: 1, kind: input, shape index: {}]   ;;  %s687_s2 = inlined_call_operand.vmem [shape: bf16[3,1,128], index: 2, kind: input, shape index: {}]   ;;  %s688_s3 = inlined_call_operand.hbm [shape: f32[8,128], index: 3, kind: output, shape index: {}]  }
   0x1   :  { %9 = vsyncpa [#allocation6], 0 }
   0x2   :  { %10 = vsyncpa [#allocation4], 0  ;;  %s610_s12 = smov [#allocation2]   ;;  %s611_s14 = smov [#allocation5]  }
   0x3   :  { %s17_s13 = sshll.u32 %s610_s12, 4  ;;  %s26_s15 = sshll.u32 %s611_s14, 4  ;;  %s18_s13 = int_to_ptr.vmem [resolvable:$true] %s17_s13  ;;  %s27_s15 = int_to_ptr.vmem [resolvable:$true] %s26_s15 }
   0x4   :  { %s552_s16 = scalar_lea.vmem %s18_s13, 128  ;;  %p557_p1 = scmp.lt.s32.totalorder %s18_s13, %s18_s13 }
   0x5   :  { %p553_p0 = scmp.ne.s32.totalorder %s18_s13, %s552_s16  ;;  %p558_p2 = scmp.lt.s32.totalorder %s552_s16, %s552_s16 }
   0x7   :  { %p559_p3 = por %p558_p2, %p557_p1 }
   0x9   :  { %p560_p4 = pnand %p559_p3, %p553_p0 }
   0xb   :  { %563 = shalt.err (!%p560_p4)
}
   0xc   :  { %20 = dma.hbm_to_vmem [thread:$0]  %s685_s0, 128, %s18_s13, [#allocation3]  }
   0xd   :  { %s572_s19 = scalar_lea.vmem %s27_s15, 3072  ;;  %p577_p6 = scmp.lt.s32.totalorder %s27_s15, %s27_s15 }
   0xe   :  { %p573_p5 = scmp.ne.s32.totalorder %s27_s15, %s572_s19  ;;  %p578_p7 = scmp.lt.s32.totalorder %s572_s19, %s572_s19 }
  0x10   :  { %p579_p8 = por %p578_p7, %p577_p6 }
  0x12   :  { %p580_p9 = pnand %p579_p8, %p573_p5 }
  0x14   :  { %583 = shalt.err (!%p580_p9)
}
  0x15   :  { %s612_s20 = smov 64   ;;  %s613_s21 = smov 4  }
  0x16   :  { %32 = dma.hbm_to_vmem [thread:$0]  %s686_s1, 3072, %s27_s15, [#allocation6], %s612_s20, %s612_s20, %s613_s21  }
  0x17   :  { %604 = dma.done.wait [#allocation3], 128  }
  0x18   :  { %605 = vsyncadd [#allocation3], 4294967168 }
  0x19   :  { %606 = dma.done.wait [#allocation6], 3072  }
  0x1a   :  { %607 = vsyncadd [#allocation6], 4294964224  ;;  %v614_v0 = vmov 0.0   ;;  %vm615_vm0 = vmmov 0   ;;  %v520_v1 = vld [vmem:[#allocation5 + $0x38] sm:$0xff]   ;;  %v521_v2 = vld [vmem:[#allocation5 + $0x30] sm:$0xff]   ;;  %v62_v25 = vlaneseq }
  0x1b   :  { %453 = vmatprep.subr.bf16.mxu0 %v614_v0  ;;  %469 = vmatprep.mubr.msk.bf16.mxu0 %vm615_vm0, %v614_v0  ;;  %v522_v3 = vld [vmem:[#allocation5 + $0x28] sm:$0xff]   ;;  %v528_v4 = vld [vmem:[#allocation5 + $0x78] sm:$0xff]   ;;  %v523_v5 = vld [vmem:[#allocation5 + $0x20] sm:$0xff]   ;;  %s616_s28 = smov [#allocation7]  }
  0x1c   :  { %473 = vmatprep.subr.bf16.mxu1 %v614_v0  ;;  %489 = vmatprep.mubr.msk.bf16.mxu1 %vm615_vm0, %v614_v0  ;;  %v529_v6 = vld [vmem:[#allocation5 + $0x70] sm:$0xff]   ;;  %v524_v7 = vld [vmem:[#allocation5 + $0x18] sm:$0xff]   ;;  %v530_v8 = vld [vmem:[#allocation5 + $0x68] sm:$0xff]   ;;  %v63_v26 = vshrl.u32 %v62_v25, 7  ;;  %s390_s29 = sshll.u32 %s616_s28, 4  ;;  %s391_s29 = int_to_ptr.vmem [resolvable:$true] %s390_s29 }
  0x1d   :  { %454 = vmatpush3.bf16.msra.mxu0 %v520_v1  ;;  %474 = vmatpush3.bf16.msra.mxu1 %v528_v4  ;;  %v525_v9 = vld [vmem:[#allocation5 + $0x10] sm:$0xff]   ;;  %v531_v10 = vld [vmem:[#allocation5 + $0x60] sm:$0xff]   ;;  %v526_v11 = vld [vmem:[#allocation5 + $0x8] sm:$0xff]   ;;  %s584_s30 = scalar_lea.vmem %s391_s29, 128  ;;  %p589_p11 = scmp.lt.s32.totalorder %s391_s29, %s391_s29 }
  0x1e   :  { %455 = vmatprep.subr.bf16.mxu0 %v614_v0  ;;  %475 = vmatprep.subr.bf16.mxu1 %v614_v0  ;;  %v532_v12 = vld [vmem:[#allocation5 + $0x58] sm:$0xff]   ;;  %v527_v13 = vld [vmem:[#allocation5] sm:$0xff]   ;;  %v533_v15 = vld [vmem:[#allocation5 + $0x50] sm:$0xff]   ;;  %v64_v29 = vsub.s32 0, %v63_v26  ;;  %p585_p10 = scmp.ne.s32.totalorder %s391_s29, %s584_s30  ;;  %p590_p12 = scmp.lt.s32.totalorder %s584_s30, %s584_s30 }
  0x1f   :  { %v42_v14 = vld [vmem:[#allocation2] sm:$0xff]  ;;  %v534_v17 = vld [vmem:[#allocation5 + $0x48] sm:$0xff]   ;;  %v535_v18 = vld [vmem:[#allocation5 + $0x40] sm:$0xff]  }
  0x20   :  { %v43_v16 = vpack.c.bf16 %v42_v14, %v42_v14  ;;  %v536_v19 = vld [vmem:[#allocation5 + $0xb8] sm:$0xff]   ;;  %v537_v20 = vld [vmem:[#allocation5 + $0xb0] sm:$0xff]   ;;  %v538_v21 = vld [vmem:[#allocation5 + $0xa8] sm:$0xff]   ;;  %p591_p13 = por %p590_p12, %p589_p11 }
  0x21   :  { %456 = vmatpush3.bf16.msra.mxu0 %v521_v2  ;;  %476 = vmatpush3.bf16.msra.mxu1 %v529_v6  ;;  %v539_v22 = vld [vmem:[#allocation5 + $0xa0] sm:$0xff]   ;;  %v540_v23 = vld [vmem:[#allocation5 + $0x98] sm:$0xff]   ;;  %v541_v24 = vld [vmem:[#allocation5 + $0x90] sm:$0xff]  }
  0x22   :  { %457 = vmatprep.subr.bf16.mxu0 %v614_v0  ;;  %477 = vmatprep.subr.bf16.mxu1 %v614_v0  ;;  %v60_v27 = vld [vmem:[%s687_s2] sm:$0x1]  ;;  %v542_v38 = vld [vmem:[#allocation5 + $0x88] sm:$0xff]   ;;  %v543_v39 = vld [vmem:[#allocation5 + $0x80] sm:$0xff]   ;;  %p592_p0 = pnand %p591_p13, %p585_p10 }
  0x23   :  { %v61_v28 = vunpack.c.l.bf16 %v60_v27  ;;  %v408_v40 = vld [vmem:[%s687_s2 + $0x1] sm:$0x1]  ;;  %v417_v50 = vld [vmem:[%s687_s2 + $0x2] sm:$0x1] }
  0x24   :  { %v175_v41 = vunpack.c.l.bf16 %v408_v40  ;;  %v289_v51 = vunpack.c.l.bf16 %v417_v50 }
  0x25   :  { %458 = vmatpush3.bf16.msra.mxu0 %v522_v3  ;;  %478 = vmatpush3.bf16.msra.mxu1 %v530_v8  ;;  %v65_v30 = vrot.slane %v61_v28, %v64_v29 }
  0x26   :  { %459 = vmatprep.subr.bf16.mxu0 %v614_v0  ;;  %479 = vmatprep.subr.bf16.mxu1 %v614_v0  ;;  %v179_v42 = vrot.slane %v175_v41, %v64_v29  ;;  %v293_v52 = vrot.slane %v289_v51, %v64_v29 }
  0x29   :  { %460 = vmatpush3.bf16.msra.mxu0 %v523_v5  ;;  %480 = vmatpush3.bf16.msra.mxu1 %v531_v10 }
  0x2a   :  { %461 = vmatprep.subr.bf16.mxu0 %v614_v0  ;;  %481 = vmatprep.subr.bf16.mxu1 %v614_v0 }
  0x2d   :  { %462 = vmatpush3.bf16.msra.mxu0 %v524_v7  ;;  %482 = vmatpush3.bf16.msra.mxu1 %v532_v12 }
  0x2e   :  { %463 = vmatprep.subr.bf16.mxu0 %v614_v0  ;;  %483 = vmatprep.subr.bf16.mxu1 %v614_v0 }
  0x31   :  { %464 = vmatpush3.bf16.msra.mxu0 %v525_v9  ;;  %484 = vmatpush3.bf16.msra.mxu1 %v533_v15 }
  0x32   :  { %465 = vmatprep.subr.bf16.mxu0 %v614_v0  ;;  %485 = vmatprep.subr.bf16.mxu1 %v614_v0 }
  0x35   :  { %466 = vmatpush3.bf16.msra.mxu0 %v526_v11  ;;  %486 = vmatpush3.bf16.msra.mxu1 %v534_v17 }
  0x36   :  { %467 = vmatprep.subr.bf16.mxu0 %v614_v0  ;;  %487 = vmatprep.subr.bf16.mxu1 %v614_v0 }
  0x39   :  { %468 = vmatpush3.bf16.msra.mxu0 %v527_v13  ;;  %488 = vmatpush3.bf16.msra.mxu1 %v535_v18 }
  0x3a   :  { %493 = vmatprep.subr.bf16.mxu0 %v614_v0 }
  0x3c   :  { %470 = vmatmul.mubr.bf16.vlgmr.msra.gmra.mxu0 %v43_v16 }
  0x3d   :  { %509 = vmatprep.mubr.msk.bf16.mxu0 %vm615_vm0, %v614_v0  ;;  %494 = vmatpush3.bf16.msra.mxu0 %v536_v19 }
  0x3e   :  { %495 = vmatprep.subr.bf16.mxu0 %v614_v0 }
  0x41   :  { %496 = vmatpush3.bf16.msra.mxu0 %v537_v20 }
  0x42   :  { %497 = vmatprep.subr.bf16.mxu0 %v614_v0 }
  0x45   :  { %498 = vmatpush3.bf16.msra.mxu0 %v538_v21 }
  0x46   :  { %499 = vmatprep.subr.bf16.mxu0 %v614_v0 }
  0x49   :  { %500 = vmatpush3.bf16.msra.mxu0 %v539_v22 }
  0x4a   :  { %501 = vmatprep.subr.bf16.mxu0 %v614_v0 }
  0x4d   :  { %502 = vmatpush3.bf16.msra.mxu0 %v540_v23 }
  0x4e   :  { %503 = vmatprep.subr.bf16.mxu0 %v614_v0 }
  0x51   :  { %504 = vmatpush3.bf16.msra.mxu0 %v541_v24 }
  0x52   :  { %505 = vmatprep.subr.bf16.mxu0 %v614_v0 }
  0x55   :  { %506 = vmatpush3.bf16.msra.mxu0 %v542_v38 }
  0x56   :  { %507 = vmatprep.subr.bf16.mxu0 %v614_v0 }
  0x59   :  { %508 = vmatpush3.bf16.msra.mxu0 %v543_v39 }
  0xfc   :  { %v148_v31 = vpop.f32.mrf.mxu0 }
  0xfd   :  { %v149_v32 = vadd.f32 %v148_v31, %v65_v30 }
  0xfe   :  { %v471_v33 = vpop.f32.mrf.mxu0 }
  0xff   :  { %v154_v34 = vmax.f32 %v149_v32, 0.0 }
 0x100   :  { %v151_v35 = vpop.f32.mrf.mxu0 }
 0x101   :  { %v155_v36 = vpack.c.bf16 %v154_v34, %v154_v34 }
 0x102   :  { %v472_v37 = vpop.f32.mrf.mxu0 }
 0x103   :  { %490 = vmatmul.mubr.bf16.vlgmr.msra.gmra.mxu1 %v155_v36 }
 0x1c3   :  { %v262_v43 = vpop.f32.mrf.mxu1 }
 0x1c4   :  { %v263_v44 = vadd.f32 %v262_v43, %v179_v42 }
 0x1c5   :  { %v491_v45 = vpop.f32.mrf.mxu1 }
 0x1c6   :  { %v268_v46 = vmax.f32 %v263_v44, 0.0 }
 0x1c7   :  { %v265_v47 = vpop.f32.mrf.mxu1 }
 0x1c8   :  { %v269_v48 = vpack.c.bf16 %v268_v46, %v268_v46 }
 0x1c9   :  { %v492_v49 = vpop.f32.mrf.mxu1 }
 0x1ca   :  { %510 = vmatmul.mubr.bf16.vlgmr.msra.gmra.mxu0 %v269_v48 }
 0x28a   :  { %v376_v53 = vpop.f32.mrf.mxu0 }
 0x28b   :  { %v377_v54 = vadd.f32 %v376_v53, %v293_v52 }
 0x28c   :  { %v511_v55 = vpop.f32.mrf.mxu0 }
 0x28d   :  { %v382_v56 = vmax.f32 %v377_v54, 0.0 }
 0x28e   :  { %v379_v57 = vpop.f32.mrf.mxu0 }
 0x28f   :  { %383 = vst [vmem:[#allocation7] sm:$0xff] %v382_v56 }
 0x290   :  { %v512_v58 = vpop.f32.mrf.mxu0 }
 0x291   :  { %595 = shalt.err (!%p592_p0)
}
 0x292   :  { %393 = dma.vmem_to_hbm [thread:$0]  %s391_s29, 128, %s688_s3, [#allocation4]  }
 0x293   :  { %608 = dma.done.wait [#allocation4], 128  }
 0x294   :  { %609 = vsyncadd [#allocation4], 4294967168 }
 0x295   :  { %397 = vsyncpa [#allocation3], 1 }
 0x296   :  { %398 = vsyncpa [#allocation6], 1 }
 0x297   :  { %399 = vsyncpa [#allocation4], 1 }

// kernel: tpu_custom_call.1
= control target key start
LH: loop header
LB: loop body
LE: loop exit
PB: predicated region body
PF: predicated region fallthrough
CT: control target
= control target key end

     0   :  { %8 = vsyncpa [#allocation3], 0  ;;  %s685_s0 = inlined_call_operand.hbm [shape: f32[8,128], index: 0, kind: input, shape index: {}]   ;;  %s686_s1 = inlined_call_operand.hbm [shape: bf16[3,128,128], index: 1, kind: input, shape index: {}]   ;;  %s687_s2 = inlined_call_operand.vmem [shape: bf16[3,1,128], index: 2, kind: input, shape index: {}]   ;;  %s688_s3 = inlined_call_operand.hbm [shape: f32[8,128], index: 3, kind: output, shape index: {}]  }
   0x1   :  { %9 = vsyncpa [#allocation6], 0 }
   0x2   :  { %10 = vsyncpa [#allocation4], 0  ;;  %s610_s12 = smov [#allocation2]   ;;  %s611_s14 = smov [#allocation5]  }
   0x3   :  { %s17_s13 = sshll.u32 %s610_s12, 4  ;;  %s26_s15 = sshll.u32 %s611_s14, 4  ;;  %s18_s13 = int_to_ptr.vmem [resolvable:$true] %s17_s13  ;;  %s27_s15 = int_to_ptr.vmem [resolvable:$true] %s26_s15 }
   0x4   :  { %s552_s16 = scalar_lea.vmem %s18_s13, 128  ;;  %p557_p1 = scmp.lt.s32.totalorder %s18_s13, %s18_s13 }
   0x5   :  { %p553_p0 = scmp.ne.s32.totalorder %s18_s13, %s552_s16  ;;  %p558_p2 = scmp.lt.s32.totalorder %s552_s16, %s552_s16 }
   0x7   :  { %p559_p3 = por %p558_p2, %p557_p1 }
   0x9   :  { %p560_p4 = pnand %p559_p3, %p553_p0 }
   0xb   :  { %563 = shalt.err (!%p560_p4)
}
   0xc   :  { %20 = dma.hbm_to_vmem [thread:$0]  %s685_s0, 128, %s18_s13, [#allocation3]  }
   0xd   :  { %s572_s19 = scalar_lea.vmem %s27_s15, 3072  ;;  %p577_p6 = scmp.lt.s32.totalorder %s27_s15, %s27_s15 }
   0xe   :  { %p573_p5 = scmp.ne.s32.totalorder %s27_s15, %s572_s19  ;;  %p578_p7 = scmp.lt.s32.totalorder %s572_s19, %s572_s19 }
  0x10   :  { %p579_p8 = por %p578_p7, %p577_p6 }
  0x12   :  { %p580_p9 = pnand %p579_p8, %p573_p5 }
  0x14   :  { %583 = shalt.err (!%p580_p9)
}
  0x15   :  { %s612_s20 = smov 64   ;;  %s613_s21 = smov 4  }
  0x16   :  { %32 = dma.hbm_to_vmem [thread:$0]  %s686_s1, 3072, %s27_s15, [#allocation6], %s612_s20, %s612_s20, %s613_s21  }
  0x17   :  { %604 = dma.done.wait [#allocation3], 128  }
  0x18   :  { %605 = vsyncadd [#allocation3], 4294967168 }
  0x19   :  { %606 = dma.done.wait [#allocation6], 3072  }
  0x1a   :  { %607 = vsyncadd [#allocation6], 4294964224  ;;  %v614_v0 = vmov 0.0   ;;  %vm615_vm0 = vmmov 0   ;;  %v520_v1 = vld [vmem:[#allocation5 + $0x38] sm:$0xff]   ;;  %v521_v2 = vld [vmem:[#allocation5 + $0x30] sm:$0xff]   ;;  %v62_v25 = vlaneseq }
  0x1b   :  { %453 = vmatprep.subr.bf16.mxu0 %v614_v0  ;;  %469 = vmatprep.mubr.msk.bf16.mxu0 %vm615_vm0, %v614_v0  ;;  %v522_v3 = vld [vmem:[#allocation5 + $0x28] sm:$0xff]   ;;  %v528_v4 = vld [vmem:[#allocation5 + $0x78] sm:$0xff]   ;;  %v523_v5 = vld [vmem:[#allocation5 + $0x20] sm:$0xff]   ;;  %s616_s28 = smov [#allocation7]  }
  0x1c   :  { %473 = vmatprep.subr.bf16.mxu1 %v614_v0  ;;  %489 = vmatprep.mubr.msk.bf16.mxu1 %vm615_vm0, %v614_v0  ;;  %v529_v6 = vld [vmem:[#allocation5 + $0x70] sm:$0xff]   ;;  %v524_v7 = vld [vmem:[#allocation5 + $0x18] sm:$0xff]   ;;  %v530_v8 = vld [vmem:[#allocation5 + $0x68] sm:$0xff]   ;;  %v63_v26 = vshrl.u32 %v62_v25, 7  ;;  %s390_s29 = sshll.u32 %s616_s28, 4  ;;  %s391_s29 = int_to_ptr.vmem [resolvable:$true] %s390_s29 }
  0x1d   :  { %454 = vmatpush3.bf16.msra.mxu0 %v520_v1  ;;  %474 = vmatpush3.bf16.msra.mxu1 %v528_v4  ;;  %v525_v9 = vld [vmem:[#allocation5 + $0x10] sm:$0xff]   ;;  %v531_v10 = vld [vmem:[#allocation5 + $0x60] sm:$0xff]   ;;  %v526_v11 = vld [vmem:[#allocation5 + $0x8] sm:$0xff]   ;;  %s584_s30 = scalar_lea.vmem %s391_s29, 128  ;;  %p589_p11 = scmp.lt.s32.totalorder %s391_s29, %s391_s29 }
  0x1e   :  { %455 = vmatprep.subr.bf16.mxu0 %v614_v0  ;;  %475 = vmatprep.subr.bf16.mxu1 %v614_v0  ;;  %v532_v12 = vld [vmem:[#allocation5 + $0x58] sm:$0xff]   ;;  %v527_v13 = vld [vmem:[#allocation5] sm:$0xff]   ;;  %v533_v15 = vld [vmem:[#allocation5 + $0x50] sm:$0xff]   ;;  %v64_v29 = vsub.s32 0, %v63_v26  ;;  %p585_p10 = scmp.ne.s32.totalorder %s391_s29, %s584_s30  ;;  %p590_p12 = scmp.lt.s32.totalorder %s584_s30, %s584_s30 }
  0x1f   :  { %v42_v14 = vld [vmem:[#allocation2] sm:$0xff]  ;;  %v534_v17 = vld [vmem:[#allocation5 + $0x48] sm:$0xff]   ;;  %v535_v18 = vld [vmem:[#allocation5 + $0x40] sm:$0xff]  }
  0x20   :  { %v43_v16 = vpack.c.bf16 %v42_v14, %v42_v14  ;;  %v536_v19 = vld [vmem:[#allocation5 + $0xb8] sm:$0xff]   ;;  %v537_v20 = vld [vmem:[#allocation5 + $0xb0] sm:$0xff]   ;;  %v538_v21 = vld [vmem:[#allocation5 + $0xa8] sm:$0xff]   ;;  %p591_p13 = por %p590_p12, %p589_p11 }
  0x21   :  { %456 = vmatpush3.bf16.msra.mxu0 %v521_v2  ;;  %476 = vmatpush3.bf16.msra.mxu1 %v529_v6  ;;  %v539_v22 = vld [vmem:[#allocation5 + $0xa0] sm:$0xff]   ;;  %v540_v23 = vld [vmem:[#allocation5 + $0x98] sm:$0xff]   ;;  %v541_v24 = vld [vmem:[#allocation5 + $0x90] sm:$0xff]  }
  0x22   :  { %457 = vmatprep.subr.bf16.mxu0 %v614_v0  ;;  %477 = vmatprep.subr.bf16.mxu1 %v614_v0  ;;  %v60_v27 = vld [vmem:[%s687_s2] sm:$0x1]  ;;  %v542_v38 = vld [vmem:[#allocation5 + $0x88] sm:$0xff]   ;;  %v543_v39 = vld [vmem:[#allocation5 + $0x80] sm:$0xff]   ;;  %p592_p0 = pnand %p591_p13, %p585_p10 }
  0x23   :  { %v61_v28 = vunpack.c.l.bf16 %v60_v27  ;;  %v408_v40 = vld [vmem:[%s687_s2 + $0x1] sm:$0x1]  ;;  %v417_v50 = vld [vmem:[%s687_s2 + $0x2] sm:$0x1] }
  0x24   :  { %v175_v41 = vunpack.c.l.bf16 %v408_v40  ;;  %v289_v51 = vunpack.c.l.bf16 %v417_v50 }
  0x25   :  { %458 = vmatpush3.bf16.msra.mxu0 %v522_v3  ;;  %478 = vmatpush3.bf16.msra.mxu1 %v530_v8  ;;  %v65_v30 = vrot.slane %v61_v28, %v64_v29 }
  0x26   :  { %459 = vmatprep.subr.bf16.mxu0 %v614_v0  ;;  %479 = vmatprep.subr.bf16.mxu1 %v614_v0  ;;  %v179_v42 = vrot.slane %v175_v41, %v64_v29  ;;  %v293_v52 = vrot.slane %v289_v51, %v64_v29 }
  0x29   :  { %460 = vmatpush3.bf16.msra.mxu0 %v523_v5  ;;  %480 = vmatpush3.bf16.msra.mxu1 %v531_v10 }
  0x2a   :  { %461 = vmatprep.subr.bf16.mxu0 %v614_v0  ;;  %481 = vmatprep.subr.bf16.mxu1 %v614_v0 }
  0x2d   :  { %462 = vmatpush3.bf16.msra.mxu0 %v524_v7  ;;  %482 = vmatpush3.bf16.msra.mxu1 %v532_v12 }
  0x2e   :  { %463 = vmatprep.subr.bf16.mxu0 %v614_v0  ;;  %483 = vmatprep.subr.bf16.mxu1 %v614_v0 }
  0x31   :  { %464 = vmatpush3.bf16.msra.mxu0 %v525_v9  ;;  %484 = vmatpush3.bf16.msra.mxu1 %v533_v15 }
  0x32   :  { %465 = vmatprep.subr.bf16.mxu0 %v614_v0  ;;  %485 = vmatprep.subr.bf16.mxu1 %v614_v0 }
  0x35   :  { %466 = vmatpush3.bf16.msra.mxu0 %v526_v11  ;;  %486 = vmatpush3.bf16.msra.mxu1 %v534_v17 }
  0x36   :  { %467 = vmatprep.subr.bf16.mxu0 %v614_v0  ;;  %487 = vmatprep.subr.bf16.mxu1 %v614_v0 }
  0x39   :  { %468 = vmatpush3.bf16.msra.mxu0 %v527_v13  ;;  %488 = vmatpush3.bf16.msra.mxu1 %v535_v18 }
  0x3a   :  { %493 = vmatprep.subr.bf16.mxu0 %v614_v0 }
  0x3c   :  { %470 = vmatmul.mubr.bf16.vlgmr.msra.gmra.mxu0 %v43_v16 }
  0x3d   :  { %509 = vmatprep.mubr.msk.bf16.mxu0 %vm615_vm0, %v614_v0  ;;  %494 = vmatpush3.bf16.msra.mxu0 %v536_v19 }
  0x3e   :  { %495 = vmatprep.subr.bf16.mxu0 %v614_v0 }
  0x41   :  { %496 = vmatpush3.bf16.msra.mxu0 %v537_v20 }
  0x42   :  { %497 = vmatprep.subr.bf16.mxu0 %v614_v0 }
  0x45   :  { %498 = vmatpush3.bf16.msra.mxu0 %v538_v21 }
  0x46   :  { %499 = vmatprep.subr.bf16.mxu0 %v614_v0 }
  0x49   :  { %500 = vmatpush3.bf16.msra.mxu0 %v539_v22 }
  0x4a   :  { %501 = vmatprep.subr.bf16.mxu0 %v614_v0 }
  0x4d   :  { %502 = vmatpush3.bf16.msra.mxu0 %v540_v23 }
  0x4e   :  { %503 = vmatprep.subr.bf16.mxu0 %v614_v0 }
  0x51   :  { %504 = vmatpush3.bf16.msra.mxu0 %v541_v24 }
  0x52   :  { %505 = vmatprep.subr.bf16.mxu0 %v614_v0 }
  0x55   :  { %506 = vmatpush3.bf16.msra.mxu0 %v542_v38 }
  0x56   :  { %507 = vmatprep.subr.bf16.mxu0 %v614_v0 }
  0x59   :  { %508 = vmatpush3.bf16.msra.mxu0 %v543_v39 }
  0xfc   :  { %v148_v31 = vpop.f32.mrf.mxu0 }
  0xfd   :  { %v149_v32 = vadd.f32 %v148_v31, %v65_v30 }
  0xfe   :  { %v471_v33 = vpop.f32.mrf.mxu0 }
  0xff   :  { %v154_v34 = vmax.f32 %v149_v32, 0.0 }
 0x100   :  { %v151_v35 = vpop.f32.mrf.mxu0 }
 0x101   :  { %v155_v36 = vpack.c.bf16 %v154_v34, %v154_v34 }
 0x102   :  { %v472_v37 = vpop.f32.mrf.mxu0 }
 0x103   :  { %490 = vmatmul.mubr.bf16.vlgmr.msra.gmra.mxu1 %v155_v36 }
 0x1c3   :  { %v262_v43 = vpop.f32.mrf.mxu1 }
 0x1c4   :  { %v263_v44 = vadd.f32 %v262_v43, %v179_v42 }
 0x1c5   :  { %v491_v45 = vpop.f32.mrf.mxu1 }
 0x1c6   :  { %v268_v46 = vmax.f32 %v263_v44, 0.0 }
 0x1c7   :  { %v265_v47 = vpop.f32.mrf.mxu1 }
 0x1c8   :  { %v269_v48 = vpack.c.bf16 %v268_v46, %v268_v46 }
 0x1c9   :  { %v492_v49 = vpop.f32.mrf.mxu1 }
 0x1ca   :  { %510 = vmatmul.mubr.bf16.vlgmr.msra.gmra.mxu0 %v269_v48 }
 0x28a   :  { %v376_v53 = vpop.f32.mrf.mxu0 }
 0x28b   :  { %v377_v54 = vadd.f32 %v376_v53, %v293_v52 }
 0x28c   :  { %v511_v55 = vpop.f32.mrf.mxu0 }
 0x28d   :  { %v382_v56 = vmax.f32 %v377_v54, 0.0 }
 0x28e   :  { %v379_v57 = vpop.f32.mrf.mxu0 }
 0x28f   :  { %383 = vst [vmem:[#allocation7] sm:$0xff] %v382_v56 }
 0x290   :  { %v512_v58 = vpop.f32.mrf.mxu0 }
 0x291   :  { %595 = shalt.err (!%p592_p0)
}
 0x292   :  { %393 = dma.vmem_to_hbm [thread:$0]  %s391_s29, 128, %s688_s3, [#allocation4]  }
 0x293   :  { %608 = dma.done.wait [#allocation4], 128  }
 0x294   :  { %609 = vsyncadd [#allocation4], 4294967168 }
 0x295   :  { %397 = vsyncpa [#allocation3], 1 }
 0x296   :  { %398 = vsyncpa [#allocation6], 1 }
 0x297   :  { %399 = vsyncpa [#allocation4], 1 }

</bundles_post_ra>
